<compile_context>
chip_gen: v6e
topology: v6e:2x2x1
jax: 0.10.0
libtpu: 0.0.40
codegen_flags: <defaults>
</compile_context>

<pallas_src>
import jax
import jax.numpy as jnp
from jax.experimental import pallas as pl
from jax.experimental.pallas import tpu as pltpu


def _vmem_capacity_bytes():
    try:
        return int(pltpu.get_tpu_info().vmem_capacity_bytes)
    except Exception:
        return 64 << 20  # conservative (v7x-sized) fallback


def _pick_blocks(N, HW, in_c, out_c, x_item, o_item, vmem_cap):
    """Pick (batch block bn, lane-axis tile tm), generation-aware.

    Double-buffered working set kept under ~3/8 of physical VMEM (≈24 MiB on
    v7x's 64 MiB, ≈48 MiB on v5e/v6e's 128 MiB); lane-tile cap raised on the
    128 MiB chips where VMEM is not the binding constraint.
    """
    budget = min(vmem_cap * 3 // 8, 48 << 20)
    cap = 8192 if vmem_cap >= (96 << 20) else 4096
    per_col = 2 * (in_c * x_item + out_c * o_item)  # dbl-buffered in+out bytes / lane col / image

    if HW <= 128:
        tm = HW                                     # full-dim block is always legal
    else:
        tm = max(128, min(budget // max(per_col, 1), cap))
        tm = (tm // 128) * 128
        if tm >= HW:
            tm = HW                                 # single full-width (legal) block
    # TODO(synk): for very large in_c on 64 MiB-VMEM chips (tm forced < ~512),
    # split in_c onto a trailing "arbitrary" grid axis with an f32 accumulator
    # instead of shrinking tm further.

    # Small feature maps: pack several images per grid step to amortize the
    # ~0.35 us fixed per-step overhead, as long as the tiles still fit VMEM.
    bn = 1
    if HW <= 512 and N > 1:
        bn_fit = max(1, budget // max(per_col * tm, 1))
        bn_max = int(min(N, 16, bn_fit))
        for cand in range(bn_max, 0, -1):
            if N % cand == 0:
                bn = cand
                break
    return bn, tm


def _make_kernel(bn):
    def kernel(x_ref, w_ref, bias_ref, o_ref):
        # x_ref:    (bn, in_c, tm)   batch slab, pixels on the lane axis
        # w_ref:    (out_c, in_c)    bf16 1x1-conv weight with BN scale folded in (grid-resident)
        # bias_ref: (out_c, 1)       f32 folded BN bias
        # o_ref:    (bn, out_c, tm)  lane-dense output tile
        w = w_ref[...]
        b = bias_ref[...]
        for i in range(bn):                          # bn is small & static -> unrolled
            x = x_ref[i]
            if x.dtype != w.dtype:
                x = x.astype(w.dtype)                # cast after VMEM load (no extra HBM pass)
            y = jnp.dot(w, x, preferred_element_type=jnp.float32)   # MXU bf16, f32 acc
            y = y + b                                # broadcast along the pixel/lane axis
            o_ref[i] = jnp.maximum(y, 0.0).astype(o_ref.dtype)
    return kernel


def channel_compress(x_nchw, conv_w, gamma, beta, run_mean, run_var,
                     eps=1e-5, out_dtype=None):
    """x_nchw: (N, in_c, H, W);  conv_w: (out_c, in_c, 1, 1). Returns (N, out_c, H, W)."""
    N, in_c, H, W = x_nchw.shape
    out_c = conv_w.shape[0]
    HW = H * W
    out_dtype = x_nchw.dtype if out_dtype is None else out_dtype

    # Fold BN (inference) into the weight / bias. Weight goes bf16 for the
    # native MXU path; bias stays f32 (added on the f32 accumulator).
    scale = gamma.astype(jnp.float32) / jnp.sqrt(run_var.astype(jnp.float32) + eps)
    w_mat = (conv_w.reshape(out_c, in_c).astype(jnp.float32)
             * scale[:, None]).astype(jnp.bfloat16)                 # (out_c, in_c)
    bias = (beta.astype(jnp.float32)
            - run_mean.astype(jnp.float32) * scale).reshape(out_c, 1)

    # x is passed in its NATIVE dtype: contiguous reshape only (free), no
    # wrapper-side astype pass over the whole tensor.
    x_mat = x_nchw.reshape(N, in_c, HW)

    vmem_cap = _vmem_capacity_bytes()
    x_item = jnp.dtype(x_mat.dtype).itemsize
    o_item = jnp.dtype(out_dtype).itemsize
    bn, tm = _pick_blocks(N, HW, in_c, out_c, x_item, o_item, vmem_cap)
    n_b = N // bn
    n_m = pl.cdiv(HW, tm)                            # edge tile handled by Pallas

    # Explicit VMEM limit: double-buffered in/out tiles + resident weight/bias,
    # with headroom, capped well under the chip's physical VMEM.
    need = 2 * bn * tm * (in_c * x_item + out_c * o_item)
    need += out_c * max(in_c, 128) * 2 + out_c * 128 * 4
    vmem_limit = int(min(max(2 * need, 16 << 20), vmem_cap * 65 // 100))

    kernel = _make_kernel(bn)

    def _call(single_buffer_resident):
        # Grid-invariant weight/bias: single-buffer (double-buffering a
        # constant block only wastes VMEM, biggest impact on v7x's 64 MiB).
        rk = {"pipeline_mode": pl.Buffered(1)} if single_buffer_resident else {}
        return pl.pallas_call(
            kernel,
            out_shape=jax.ShapeDtypeStruct((N, out_c, HW), out_dtype),
            grid_spec=pltpu.PrefetchScalarGridSpec(
                num_scalar_prefetch=0,
                grid=(n_b, n_m),
                in_specs=[
                    pl.BlockSpec((bn, in_c, tm), lambda n, m: (n, 0, m)),
                    pl.BlockSpec((out_c, in_c), lambda n, m: (0, 0), **rk),
                    pl.BlockSpec((out_c, 1), lambda n, m: (0, 0), **rk),
                ],
                out_specs=pl.BlockSpec((bn, out_c, tm), lambda n, m: (n, 0, m)),
            ),
            compiler_params=pltpu.CompilerParams(
                dimension_semantics=("parallel", "parallel"),
                vmem_limit_bytes=vmem_limit),
        )(x_mat, w_mat, bias)

    try:
        out = _call(True)
    except Exception:
        # Compatibility fallback: JAX versions where pipeline_mode on
        # pallas_call inputs is unsupported. Weight/bias are small, so the
        # extra buffer is acceptable there.
        out = _call(False)

    return out.reshape(N, out_c, H, W)               # contiguous view: free


def _reference(x_nchw, conv_w, gamma, beta, run_mean, run_var, eps=1e-5):
    # Pure-JAX f32 reference (conv1x1 -> BN eval -> ReLU).
    w_mat = conv_w.reshape(conv_w.shape[0], conv_w.shape[1])     # (out_c, in_c)
    y = jnp.einsum('nchw,oc->nohw', x_nchw, w_mat)
    scale = gamma / jnp.sqrt(run_var + eps)
    bias = beta - run_mean * scale
    y = y * scale[None, :, None, None] + bias[None, :, None, None]
    return jnp.maximum(y, 0.0)


if __name__ == "__main__":
    key = jax.random.PRNGKey(0)
    k_x, k_w, k_g, k_b, k_m, k_v = jax.random.split(key, 6)

    N, in_c, H, W = 2, 16, 16, 16
    out_c = 8

    # bf16 activations end-to-end (halved HBM traffic, native MXU path); the
    # kernel accumulates in f32 and writes bf16 output.
    x = jax.random.normal(k_x, (N, in_c, H, W), dtype=jnp.float32).astype(jnp.bfloat16)
    conv_w = jax.random.normal(k_w, (out_c, in_c, 1, 1), dtype=jnp.float32) * 0.1
    gamma = 1.0 + 0.1 * jax.random.normal(k_g, (out_c,), dtype=jnp.float32)
    beta = 0.1 * jax.random.normal(k_b, (out_c,), dtype=jnp.float32)
    run_mean = 0.05 * jax.random.normal(k_m, (out_c,), dtype=jnp.float32)
    run_var = 1.0 + 0.1 * jnp.abs(jax.random.normal(k_v, (out_c,), dtype=jnp.float32))

    out = channel_compress(x, conv_w, gamma, beta, run_mean, run_var)
    out = jax.block_until_ready(out)

    ref = _reference(x.astype(jnp.float32), conv_w, gamma, beta, run_mean, run_var)
    assert out.shape == (N, out_c, H, W)
    assert out.dtype == x.dtype
    # bf16 weight / output rounding -> relaxed tolerance (f32 accumulation keeps it tight).
    ok = jnp.allclose(out.astype(jnp.float32), ref, atol=3e-2, rtol=3e-2)
    assert ok, float(jnp.max(jnp.abs(out.astype(jnp.float32) - ref)))

    print("KERNEL_OK")
</pallas_src>

<mosaic_0001>
module attributes {stable_mosaic.version = 11 : i64} {
  func.func @kernel(%arg0: i32, %arg1: i32, %arg2: memref<2x16x256xbf16, #tpu.memory_space<vmem>>, %arg3: memref<8x16xbf16, #tpu.memory_space<vmem>>, %arg4: memref<8x1xf32, #tpu.memory_space<vmem>>, %arg5: memref<2x8x256xbf16, #tpu.memory_space<vmem>>) attributes {dimension_semantics = [#tpu.dimension_semantics<parallel>, #tpu.dimension_semantics<parallel>], iteration_bounds = array<i64: 1, 1>, scalar_prefetch = 0 : i64, scratch_operands = 0 : i64, tpu.core_type = #tpu.core_type<tc>, window_params = [{transform_indices = @transform_0, window_bounds = array<i64: 2, 16, 256>}, {pipeline_mode = #tpu.pipeline_mode<synchronous>, transform_indices = @transform_1, window_bounds = array<i64: 8, 16>}, {pipeline_mode = #tpu.pipeline_mode<synchronous>, transform_indices = @transform_2, window_bounds = array<i64: 8, 1>}, {transform_indices = @transform_3, window_bounds = array<i64: 2, 8, 256>}]} {
    %c0 = arith.constant 0 : index
    %c0_0 = arith.constant 0 : index
    %0 = vector.load %arg3[%c0, %c0_0] : memref<8x16xbf16, #tpu.memory_space<vmem>>, vector<8x16xbf16>
    %c0_1 = arith.constant 0 : index
    %c0_2 = arith.constant 0 : index
    %1 = vector.load %arg4[%c0_1, %c0_2] : memref<8x1xf32, #tpu.memory_space<vmem>>, vector<8x1xf32>
    %c0_3 = arith.constant 0 : index
    %c0_4 = arith.constant 0 : index
    %c0_5 = arith.constant 0 : index
    %2 = vector.load %arg2[%c0_3, %c0_4, %c0_5] : memref<2x16x256xbf16, #tpu.memory_space<vmem>>, vector<1x16x256xbf16>
    %3 = vector.shape_cast %2 : vector<1x16x256xbf16> to vector<16x256xbf16>
    %cst = arith.constant dense<0.000000e+00> : vector<8x256xf32>
    %4 = tpu.matmul %0, %3, %cst {dimension_numbers = #tpu.dot_dimension_numbers<[1], [0], [0], [1], [0, 0, 1, 1], [], []>} : vector<8x16xbf16>, vector<16x256xbf16>, vector<8x256xf32> -> vector<8x256xf32>
    %5 = vector.broadcast %1 : vector<8x1xf32> to vector<8x256xf32>
    %6 = arith.addf %4, %5 : vector<8x256xf32>
    %cst_6 = arith.constant 0.000000e+00 : f32
    %7 = vector.broadcast %cst_6 : f32 to vector<8x256xf32>
    %8 = arith.maximumf %6, %7 : vector<8x256xf32>
    %9 = arith.truncf %8 : vector<8x256xf32> to vector<8x256xbf16>
    %c0_7 = arith.constant 0 : index
    %c0_8 = arith.constant 0 : index
    %c0_9 = arith.constant 0 : index
    %10 = vector.load %arg5[%c0_7, %c0_8, %c0_9] : memref<2x8x256xbf16, #tpu.memory_space<vmem>>, vector<1x8x256xbf16>
    %11 = vector.shape_cast %10 : vector<1x8x256xbf16> to vector<8x256xbf16>
    %12 = vector.shape_cast %9 : vector<8x256xbf16> to vector<1x8x256xbf16>
    tpu.vector_store %arg5[%c0_7, %c0_8, %c0_9], %12 {strides = array<i32>} : memref<2x8x256xbf16, #tpu.memory_space<vmem>>, vector<1x8x256xbf16>,
    %c1 = arith.constant 1 : index
    %c0_10 = arith.constant 0 : index
    %c0_11 = arith.constant 0 : index
    %13 = vector.load %arg2[%c1, %c0_10, %c0_11] : memref<2x16x256xbf16, #tpu.memory_space<vmem>>, vector<1x16x256xbf16>
    %14 = vector.shape_cast %13 : vector<1x16x256xbf16> to vector<16x256xbf16>
    %cst_12 = arith.constant dense<0.000000e+00> : vector<8x256xf32>
    %15 = tpu.matmul %0, %14, %cst_12 {dimension_numbers = #tpu.dot_dimension_numbers<[1], [0], [0], [1], [0, 0, 1, 1], [], []>} : vector<8x16xbf16>, vector<16x256xbf16>, vector<8x256xf32> -> vector<8x256xf32>
    %16 = vector.broadcast %1 : vector<8x1xf32> to vector<8x256xf32>
    %17 = arith.addf %15, %16 : vector<8x256xf32>
    %cst_13 = arith.constant 0.000000e+00 : f32
    %18 = vector.broadcast %cst_13 : f32 to vector<8x256xf32>
    %19 = arith.maximumf %17, %18 : vector<8x256xf32>
    %20 = arith.truncf %19 : vector<8x256xf32> to vector<8x256xbf16>
    %c1_14 = arith.constant 1 : index
    %c0_15 = arith.constant 0 : index
    %c0_16 = arith.constant 0 : index
    %21 = vector.load %arg5[%c1_14, %c0_15, %c0_16] : memref<2x8x256xbf16, #tpu.memory_space<vmem>>, vector<1x8x256xbf16>
    %22 = vector.shape_cast %21 : vector<1x8x256xbf16> to vector<8x256xbf16>
    %23 = vector.shape_cast %20 : vector<8x256xbf16> to vector<1x8x256xbf16>
    tpu.vector_store %arg5[%c1_14, %c0_15, %c0_16], %23 {strides = array<i32>} : memref<2x8x256xbf16, #tpu.memory_space<vmem>>, vector<1x8x256xbf16>,
    return
  }
  func.func @transform_0(%arg0: i32, %arg1: i32) -> (i32, i32, i32) {
    %c0_i32 = arith.constant 0 : i32
    %c0_i32_0 = arith.constant 0 : i32
    return %arg0, %c0_i32, %arg1 : i32, i32, i32
  }
  func.func @transform_1(%arg0: i32, %arg1: i32) -> (i32, i32) {
    %c0_i32 = arith.constant 0 : i32
    %c0_i32_0 = arith.constant 0 : i32
    %c0_i32_1 = arith.constant 0 : i32
    return %c0_i32, %c0_i32_0 : i32, i32
  }
  func.func @transform_2(%arg0: i32, %arg1: i32) -> (i32, i32) {
    %c0_i32 = arith.constant 0 : i32
    %c0_i32_0 = arith.constant 0 : i32
    %c0_i32_1 = arith.constant 0 : i32
    return %c0_i32, %c0_i32_0 : i32, i32
  }
  func.func @transform_3(%arg0: i32, %arg1: i32) -> (i32, i32, i32) {
    %c0_i32 = arith.constant 0 : i32
    %c0_i32_0 = arith.constant 0 : i32
    return %arg0, %c0_i32, %arg1 : i32, i32, i32
  }
}

module attributes {stable_mosaic.version = 11 : i64} {
  func.func @kernel(%arg0: i32, %arg1: i32, %arg2: memref<2x16x256xbf16, #tpu.memory_space<vmem>>, %arg3: memref<8x16xbf16, #tpu.memory_space<vmem>>, %arg4: memref<8x1xf32, #tpu.memory_space<vmem>>, %arg5: memref<2x8x256xbf16, #tpu.memory_space<vmem>>) attributes {dimension_semantics = [#tpu.dimension_semantics<parallel>, #tpu.dimension_semantics<parallel>], iteration_bounds = array<i64: 1, 1>, scalar_prefetch = 0 : i64, scratch_operands = 0 : i64, tpu.core_type = #tpu.core_type<tc>, window_params = [{transform_indices = @transform_0, window_bounds = array<i64: 2, 16, 256>}, {pipeline_mode = #tpu.pipeline_mode<synchronous>, transform_indices = @transform_1, window_bounds = array<i64: 8, 16>}, {pipeline_mode = #tpu.pipeline_mode<synchronous>, transform_indices = @transform_2, window_bounds = array<i64: 8, 1>}, {transform_indices = @transform_3, window_bounds = array<i64: 2, 8, 256>}]} {
    %c0 = arith.constant 0 : index
    %c0_0 = arith.constant 0 : index
    %0 = vector.load %arg3[%c0, %c0_0] : memref<8x16xbf16, #tpu.memory_space<vmem>>, vector<8x16xbf16>
    %c0_1 = arith.constant 0 : index
    %c0_2 = arith.constant 0 : index
    %1 = vector.load %arg4[%c0_1, %c0_2] : memref<8x1xf32, #tpu.memory_space<vmem>>, vector<8x1xf32>
    %c0_3 = arith.constant 0 : index
    %c0_4 = arith.constant 0 : index
    %c0_5 = arith.constant 0 : index
    %2 = vector.load %arg2[%c0_3, %c0_4, %c0_5] : memref<2x16x256xbf16, #tpu.memory_space<vmem>>, vector<1x16x256xbf16>
    %3 = vector.shape_cast %2 : vector<1x16x256xbf16> to vector<16x256xbf16>
    %cst = arith.constant dense<0.000000e+00> : vector<8x256xf32>
    %4 = tpu.matmul %0, %3, %cst {dimension_numbers = #tpu.dot_dimension_numbers<[1], [0], [0], [1], [0, 0, 1, 1], [], []>} : vector<8x16xbf16>, vector<16x256xbf16>, vector<8x256xf32> -> vector<8x256xf32>
    %5 = vector.broadcast %1 : vector<8x1xf32> to vector<8x256xf32>
    %6 = arith.addf %4, %5 : vector<8x256xf32>
    %cst_6 = arith.constant 0.000000e+00 : f32
    %7 = vector.broadcast %cst_6 : f32 to vector<8x256xf32>
    %8 = arith.maximumf %6, %7 : vector<8x256xf32>
    %9 = arith.truncf %8 : vector<8x256xf32> to vector<8x256xbf16>
    %c0_7 = arith.constant 0 : index
    %c0_8 = arith.constant 0 : index
    %c0_9 = arith.constant 0 : index
    %10 = vector.load %arg5[%c0_7, %c0_8, %c0_9] : memref<2x8x256xbf16, #tpu.memory_space<vmem>>, vector<1x8x256xbf16>
    %11 = vector.shape_cast %10 : vector<1x8x256xbf16> to vector<8x256xbf16>
    %12 = vector.shape_cast %9 : vector<8x256xbf16> to vector<1x8x256xbf16>
    tpu.vector_store %arg5[%c0_7, %c0_8, %c0_9], %12 {strides = array<i32>} : memref<2x8x256xbf16, #tpu.memory_space<vmem>>, vector<1x8x256xbf16>,
    %c1 = arith.constant 1 : index
    %c0_10 = arith.constant 0 : index
    %c0_11 = arith.constant 0 : index
    %13 = vector.load %arg2[%c1, %c0_10, %c0_11] : memref<2x16x256xbf16, #tpu.memory_space<vmem>>, vector<1x16x256xbf16>
    %14 = vector.shape_cast %13 : vector<1x16x256xbf16> to vector<16x256xbf16>
    %cst_12 = arith.constant dense<0.000000e+00> : vector<8x256xf32>
    %15 = tpu.matmul %0, %14, %cst_12 {dimension_numbers = #tpu.dot_dimension_numbers<[1], [0], [0], [1], [0, 0, 1, 1], [], []>} : vector<8x16xbf16>, vector<16x256xbf16>, vector<8x256xf32> -> vector<8x256xf32>
    %16 = vector.broadcast %1 : vector<8x1xf32> to vector<8x256xf32>
    %17 = arith.addf %15, %16 : vector<8x256xf32>
    %cst_13 = arith.constant 0.000000e+00 : f32
    %18 = vector.broadcast %cst_13 : f32 to vector<8x256xf32>
    %19 = arith.maximumf %17, %18 : vector<8x256xf32>
    %20 = arith.truncf %19 : vector<8x256xf32> to vector<8x256xbf16>
    %c1_14 = arith.constant 1 : index
    %c0_15 = arith.constant 0 : index
    %c0_16 = arith.constant 0 : index
    %21 = vector.load %arg5[%c1_14, %c0_15, %c0_16] : memref<2x8x256xbf16, #tpu.memory_space<vmem>>, vector<1x8x256xbf16>
    %22 = vector.shape_cast %21 : vector<1x8x256xbf16> to vector<8x256xbf16>
    %23 = vector.shape_cast %20 : vector<8x256xbf16> to vector<1x8x256xbf16>
    tpu.vector_store %arg5[%c1_14, %c0_15, %c0_16], %23 {strides = array<i32>} : memref<2x8x256xbf16, #tpu.memory_space<vmem>>, vector<1x8x256xbf16>,
    return
  }
  func.func @transform_0(%arg0: i32, %arg1: i32) -> (i32, i32, i32) {
    %c0_i32 = arith.constant 0 : i32
    %c0_i32_0 = arith.constant 0 : i32
    return %arg0, %c0_i32, %arg1 : i32, i32, i32
  }
  func.func @transform_1(%arg0: i32, %arg1: i32) -> (i32, i32) {
    %c0_i32 = arith.constant 0 : i32
    %c0_i32_0 = arith.constant 0 : i32
    %c0_i32_1 = arith.constant 0 : i32
    return %c0_i32, %c0_i32_0 : i32, i32
  }
  func.func @transform_2(%arg0: i32, %arg1: i32) -> (i32, i32) {
    %c0_i32 = arith.constant 0 : i32
    %c0_i32_0 = arith.constant 0 : i32
    %c0_i32_1 = arith.constant 0 : i32
    return %c0_i32, %c0_i32_0 : i32, i32
  }
  func.func @transform_3(%arg0: i32, %arg1: i32) -> (i32, i32, i32) {
    %c0_i32 = arith.constant 0 : i32
    %c0_i32_0 = arith.constant 0 : i32
    return %arg0, %c0_i32, %arg1 : i32, i32, i32
  }
}

</mosaic_0001>

<bundles_post_ra>
// kernel: tpu_custom_call.1
= control target key start
LH: loop header
LB: loop body
LE: loop exit
PB: predicated region body
PF: predicated region fallthrough
CT: control target
= control target key end

     0   :  { %8 = vsyncpa [#allocation3], 0  ;;  %s297_s0 = inlined_call_operand.hbm [shape: bf16[2,16,256], index: 0, kind: input, shape index: {}]   ;;  %s298_s1 = inlined_call_operand.vmem [shape: bf16[8,16], index: 1, kind: input, shape index: {}]   ;;  %s299_s2 = inlined_call_operand.vmem [shape: f32[8,1], index: 2, kind: input, shape index: {}]   ;;  %s300_s3 = inlined_call_operand.hbm [shape: bf16[2,8,256], index: 3, kind: output, shape index: {}]  }
   0x1   :  { %9 = vsyncpa [#allocation4], 0  ;;  %s254_s12 = smov [#allocation2]  }
   0x2   :  { %s15_s13 = sshll.u32 %s254_s12, 4  ;;  %s16_s13 = int_to_ptr.vmem [resolvable:$true] %s15_s13 }
   0x3   :  { %s218_s14 = scalar_lea.vmem %s16_s13, 512  ;;  %p223_p1 = scmp.lt.s32.totalorder %s16_s13, %s16_s13 }
   0x4   :  { %p219_p0 = scmp.ne.s32.totalorder %s16_s13, %s218_s14  ;;  %p224_p2 = scmp.lt.s32.totalorder %s218_s14, %s218_s14 }
   0x6   :  { %p225_p3 = por %p224_p2, %p223_p1 }
   0x8   :  { %p226_p4 = pnand %p225_p3, %p219_p0 }
   0xa   :  { %229 = shalt.err (!%p226_p4)
}
   0xb   :  { %s255_s15 = smov 128   ;;  %s256_s16 = smov 8  }
   0xc   :  { %21 = dma.hbm_to_vmem [thread:$0]  %s297_s0, 512, %s16_s13, [#allocation3], %s255_s15, %s255_s15, %s256_s16  }
   0xd   :  { %250 = dma.done.wait [#allocation3], 512  }
   0xe   :  { %251 = vsyncadd [#allocation3], 4294966784  ;;  %v257_v0 = vmov 0   ;;  %v204_v1 = vld [vmem:[#allocation2 + $0x4] ss:$8 sps:$4 sm:$0xff]   ;;  %vm49_vm0 = vcmask 130048  }
   0xf   :  { %85 = vmatprep.mubr.bf16.mxu0 %v257_v0  ;;  %150 = vmatprep.mubr.bf16.mxu1 %v257_v0  ;;  %v206_v2 = vld [vmem:[#allocation2 + $0x14] ss:$8 sps:$4 sm:$0xff]   ;;  %v208_v3 = vld [vmem:[#allocation2] ss:$8 sps:$4 sm:$0xff]   ;;  %v209_v4 = vld [vmem:[#allocation2 + $0x10] ss:$8 sps:$4 sm:$0xff]  }
  0x10   :  { %203 = vset.pattern.permute.xlu0 %v257_v0  ;;  %67 = vmatprep.subr.bf16.mxu0 %v204_v1  ;;  %v31_v5 = vld [vmem:[%s299_s2] sm:$0xff]  ;;  %s258_s2 = smov [#allocation5]  }
  0x11   :  { %132 = vmatprep.subr.bf16.mxu1 %v206_v2  ;;  %68 = vmatpush1.bf16.msra.mxu0 %v208_v3  ;;  %v30_v6 = vld [vmem:[%s298_s1] sm:$0xf]  ;;  %s176_s22 = sshll.u32 %s258_s2, 4  ;;  %s177_s22 = int_to_ptr.vmem [resolvable:$true] %s176_s22 }
  0x12   :  { %133 = vmatpush1.bf16.msra.mxu1 %v209_v4  ;;  %36 = vperm.xlu0 %203, %v31_v5   ;;  %s230_s1 = scalar_lea.vmem %s177_s22, 256  ;;  %p235_p6 = scmp.lt.s32.totalorder %s177_s22, %s177_s22 }
  0x13   :  { %p231_p5 = scmp.ne.s32.totalorder %s177_s22, %s230_s1  ;;  %p236_p7 = scmp.lt.s32.totalorder %s230_s1, %s230_s1 }
  0x14   :  { %190 = vmatmul.mubr.msk.bf16.vlgmr.msra.gmra.mxu0 %vm49_vm0, %v30_v6 }
  0x15   :  { %194 = vmatmul.mubr.msk.bf16.vlgmr.msra.gmra.mxu1 %vm49_vm0, %v30_v6  ;;  %p237_p8 = por %p236_p7, %p235_p6 }
  0x17   :  { %p238_p9 = pnand %p237_p8, %p231_p5 }
  0x8d   :  { %v37_v7 = vpop.permute.xlu0 %36 }
  0xd4   :  { %v87_v8 = vpop.f32.mrf.mxu0 }
  0xd5   :  { %v152_v9 = vpop.f32.mrf.mxu1  ;;  %v88_v10 = vadd.f32 %v87_v8, %v37_v7 }
  0xd6   :  { %v153_v11 = vadd.f32 %v152_v9, %v37_v7  ;;  %v89_v12 = vpop.f32.mrf.mxu0 }
  0xd7   :  { %v154_v13 = vpop.f32.mrf.mxu1  ;;  %v90_v14 = vadd.f32 %v89_v12, %v37_v7  ;;  %v94_v18 = vmax.f32 %v88_v10, 0.0 }
  0xd8   :  { %v155_v15 = vadd.f32 %v154_v13, %v37_v7  ;;  %v91_v16 = vpop.f32.mrf.mxu0  ;;  %v159_v19 = vmax.f32 %v153_v11, 0.0 }
  0xd9   :  { %v156_v17 = vpop.f32.mrf.mxu1  ;;  %v95_v20 = vmax.f32 %v90_v14, 0.0 }
  0xda   :  { %v160_v21 = vmax.f32 %v155_v15, 0.0  ;;  %v92_v22 = vpop.f32.mrf.mxu0 }
  0xdb   :  { %v157_v23 = vpop.f32.mrf.mxu1  ;;  %v196_v24 = vpack.c.bf16 %v95_v20, %v94_v18 }
  0xdc   :  { %v197_v25 = vpack.c.bf16 %v160_v21, %v159_v19 }
  0xdd   :  { %104 = vst [vmem:[#allocation5] sm:$0xff] %v196_v24 }
  0xde   :  { %170 = vst [vmem:[#allocation5 + $0x8] sm:$0xff] %v197_v25 }
  0xdf   :  { %241 = shalt.err (!%p238_p9)
}
  0xe0   :  { %182 = dma.vmem_to_hbm [thread:$0]  %s177_s22, 256, %s300_s3, [#allocation4], %s255_s15, %s255_s15, %s256_s16  }
  0xe1   :  { %252 = dma.done.wait [#allocation4], 256  }
  0xe2   :  { %253 = vsyncadd [#allocation4], 4294967040 }
  0xe3   :  { %186 = vsyncpa [#allocation3], 1 }
  0xe4   :  { %187 = vsyncpa [#allocation4], 1 }

// kernel: tpu_custom_call.1
= control target key start
LH: loop header
LB: loop body
LE: loop exit
PB: predicated region body
PF: predicated region fallthrough
CT: control target
= control target key end

     0   :  { %8 = vsyncpa [#allocation3], 0  ;;  %s297_s0 = inlined_call_operand.hbm [shape: bf16[2,16,256], index: 0, kind: input, shape index: {}]   ;;  %s298_s1 = inlined_call_operand.vmem [shape: bf16[8,16], index: 1, kind: input, shape index: {}]   ;;  %s299_s2 = inlined_call_operand.vmem [shape: f32[8,1], index: 2, kind: input, shape index: {}]   ;;  %s300_s3 = inlined_call_operand.hbm [shape: bf16[2,8,256], index: 3, kind: output, shape index: {}]  }
   0x1   :  { %9 = vsyncpa [#allocation4], 0  ;;  %s254_s12 = smov [#allocation2]  }
   0x2   :  { %s15_s13 = sshll.u32 %s254_s12, 4  ;;  %s16_s13 = int_to_ptr.vmem [resolvable:$true] %s15_s13 }
   0x3   :  { %s218_s14 = scalar_lea.vmem %s16_s13, 512  ;;  %p223_p1 = scmp.lt.s32.totalorder %s16_s13, %s16_s13 }
   0x4   :  { %p219_p0 = scmp.ne.s32.totalorder %s16_s13, %s218_s14  ;;  %p224_p2 = scmp.lt.s32.totalorder %s218_s14, %s218_s14 }
   0x6   :  { %p225_p3 = por %p224_p2, %p223_p1 }
   0x8   :  { %p226_p4 = pnand %p225_p3, %p219_p0 }
   0xa   :  { %229 = shalt.err (!%p226_p4)
}
   0xb   :  { %s255_s15 = smov 128   ;;  %s256_s16 = smov 8  }
   0xc   :  { %21 = dma.hbm_to_vmem [thread:$0]  %s297_s0, 512, %s16_s13, [#allocation3], %s255_s15, %s255_s15, %s256_s16  }
   0xd   :  { %250 = dma.done.wait [#allocation3], 512  }
   0xe   :  { %251 = vsyncadd [#allocation3], 4294966784  ;;  %v257_v0 = vmov 0   ;;  %v204_v1 = vld [vmem:[#allocation2 + $0x4] ss:$8 sps:$4 sm:$0xff]   ;;  %vm49_vm0 = vcmask 130048  }
   0xf   :  { %85 = vmatprep.mubr.bf16.mxu0 %v257_v0  ;;  %150 = vmatprep.mubr.bf16.mxu1 %v257_v0  ;;  %v206_v2 = vld [vmem:[#allocation2 + $0x14] ss:$8 sps:$4 sm:$0xff]   ;;  %v208_v3 = vld [vmem:[#allocation2] ss:$8 sps:$4 sm:$0xff]   ;;  %v209_v4 = vld [vmem:[#allocation2 + $0x10] ss:$8 sps:$4 sm:$0xff]  }
  0x10   :  { %203 = vset.pattern.permute.xlu0 %v257_v0  ;;  %67 = vmatprep.subr.bf16.mxu0 %v204_v1  ;;  %v31_v5 = vld [vmem:[%s299_s2] sm:$0xff]  ;;  %s258_s2 = smov [#allocation5]  }
  0x11   :  { %132 = vmatprep.subr.bf16.mxu1 %v206_v2  ;;  %68 = vmatpush1.bf16.msra.mxu0 %v208_v3  ;;  %v30_v6 = vld [vmem:[%s298_s1] sm:$0xf]  ;;  %s176_s22 = sshll.u32 %s258_s2, 4  ;;  %s177_s22 = int_to_ptr.vmem [resolvable:$true] %s176_s22 }
  0x12   :  { %133 = vmatpush1.bf16.msra.mxu1 %v209_v4  ;;  %36 = vperm.xlu0 %203, %v31_v5   ;;  %s230_s1 = scalar_lea.vmem %s177_s22, 256  ;;  %p235_p6 = scmp.lt.s32.totalorder %s177_s22, %s177_s22 }
  0x13   :  { %p231_p5 = scmp.ne.s32.totalorder %s177_s22, %s230_s1  ;;  %p236_p7 = scmp.lt.s32.totalorder %s230_s1, %s230_s1 }
  0x14   :  { %190 = vmatmul.mubr.msk.bf16.vlgmr.msra.gmra.mxu0 %vm49_vm0, %v30_v6 }
  0x15   :  { %194 = vmatmul.mubr.msk.bf16.vlgmr.msra.gmra.mxu1 %vm49_vm0, %v30_v6  ;;  %p237_p8 = por %p236_p7, %p235_p6 }
  0x17   :  { %p238_p9 = pnand %p237_p8, %p231_p5 }
  0x8d   :  { %v37_v7 = vpop.permute.xlu0 %36 }
  0xd4   :  { %v87_v8 = vpop.f32.mrf.mxu0 }
  0xd5   :  { %v152_v9 = vpop.f32.mrf.mxu1  ;;  %v88_v10 = vadd.f32 %v87_v8, %v37_v7 }
  0xd6   :  { %v153_v11 = vadd.f32 %v152_v9, %v37_v7  ;;  %v89_v12 = vpop.f32.mrf.mxu0 }
  0xd7   :  { %v154_v13 = vpop.f32.mrf.mxu1  ;;  %v90_v14 = vadd.f32 %v89_v12, %v37_v7  ;;  %v94_v18 = vmax.f32 %v88_v10, 0.0 }
  0xd8   :  { %v155_v15 = vadd.f32 %v154_v13, %v37_v7  ;;  %v91_v16 = vpop.f32.mrf.mxu0  ;;  %v159_v19 = vmax.f32 %v153_v11, 0.0 }
  0xd9   :  { %v156_v17 = vpop.f32.mrf.mxu1  ;;  %v95_v20 = vmax.f32 %v90_v14, 0.0 }
  0xda   :  { %v160_v21 = vmax.f32 %v155_v15, 0.0  ;;  %v92_v22 = vpop.f32.mrf.mxu0 }
  0xdb   :  { %v157_v23 = vpop.f32.mrf.mxu1  ;;  %v196_v24 = vpack.c.bf16 %v95_v20, %v94_v18 }
  0xdc   :  { %v197_v25 = vpack.c.bf16 %v160_v21, %v159_v19 }
  0xdd   :  { %104 = vst [vmem:[#allocation5] sm:$0xff] %v196_v24 }
  0xde   :  { %170 = vst [vmem:[#allocation5 + $0x8] sm:$0xff] %v197_v25 }
  0xdf   :  { %241 = shalt.err (!%p238_p9)
}
  0xe0   :  { %182 = dma.vmem_to_hbm [thread:$0]  %s177_s22, 256, %s300_s3, [#allocation4], %s255_s15, %s255_s15, %s256_s16  }
  0xe1   :  { %252 = dma.done.wait [#allocation4], 256  }
  0xe2   :  { %253 = vsyncadd [#allocation4], 4294967040 }
  0xe3   :  { %186 = vsyncpa [#allocation3], 1 }
  0xe4   :  { %187 = vsyncpa [#allocation4], 1 }

</bundles_post_ra>
